<compile_context>
chip_gen: v6e
topology: v6e:2x2x1
jax: 0.10.0
libtpu: 0.0.40
codegen_flags: <defaults>
</compile_context>

<pallas_src>
import jax
import jax.numpy as jnp
from jax.experimental import pallas as pl
from jax.experimental.pallas import tpu as pltpu

_MAX_DMA_CHUNKS = 8            # a handful of in-flight DMAs saturates HBM BW
_MIN_BYTES_PER_CHUNK = 1 << 20  # don't split below ~1 MiB per DMA


def _chunk_bounds(dim0, nbytes):
    """Static (start, size) chunks along the leading axis.

    Splits the copy into at most _MAX_DMA_CHUNKS concurrent DMAs, but never
    below ~1 MiB per DMA (tiny tensors use a single DMA).  All boundaries are
    Python ints -> fully static slices inside the kernel.
    """
    if dim0 <= 1:
        return [(0, dim0)]
    n = min(_MAX_DMA_CHUNKS, dim0, max(1, nbytes // _MIN_BYTES_PER_CHUNK))
    base, rem = divmod(dim0, n)
    bounds, start = [], 0
    for i in range(n):
        size = base + (1 if i < rem else 0)
        if size:
            bounds.append((start, size))
        start += size
    return bounds


def _make_identity_kernel(bounds):
    """Kernel: issue all HBM->HBM chunk DMAs, then wait on all of them."""

    def kernel(x_hbm, o_hbm, sem):
        copies = [
            pltpu.make_async_copy(
                x_hbm.at[pl.ds(start, size)],
                o_hbm.at[pl.ds(start, size)],
                sem.at[i],
            )
            for i, (start, size) in enumerate(bounds)
        ]
        for cp in copies:   # start everything -> DMAs run concurrently
            cp.start()
        for cp in copies:   # then block until all have landed
            cp.wait()

    return kernel


def _identity_pallas(x):
    """Identity via direct HBM->HBM DMA (no VMEM staging, no tiling)."""
    nbytes = int(x.size) * jnp.dtype(x.dtype).itemsize
    bounds = _chunk_bounds(int(x.shape[0]), nbytes)
    n_chunks = len(bounds)
    return pl.pallas_call(
        _make_identity_kernel(bounds),
        out_shape=jax.ShapeDtypeStruct(x.shape, x.dtype),
        in_specs=[pl.BlockSpec(memory_space=pl.ANY)],    # leave input in HBM
        out_specs=pl.BlockSpec(memory_space=pl.ANY),     # write output in HBM
        scratch_shapes=[pltpu.SemaphoreType.DMA((n_chunks,))],
        cost_estimate=pl.CostEstimate(
            flops=0, transcendentals=0, bytes_accessed=2 * nbytes),
    )(x)


# ---------------------------------------------------------------------------
# JAX-side "module" mirroring Model_
# ---------------------------------------------------------------------------
class ModelBase:
    """JAX/Pallas analogue of DeepWP Model_ (abstract base, no parameters)."""

    def __init__(self):
        # Abstract base class: no learnable parameters, no buffers.
        self.params = {}

    @property
    def num_parameters(self):
        total = sum(int(jnp.size(p)) for p in jax.tree_util.tree_leaves(self.params))
        # All params (none) are trainable.
        return (total, total)

    def forward(self, x):
        """Identity pass-through routed through the Pallas DMA-copy kernel.

        Accepts any shape/dtype (the PyTorch base class is shape-agnostic);
        returns a fresh array of identical shape/dtype produced on the TPU.
        """
        x = jnp.asarray(x)
        if x.ndim == 0 or x.size == 0:
            # Degenerate inputs: not worth a kernel launch.
            return x
        return _identity_pallas(x)

    def __call__(self, x):
        return self.forward(x)


if __name__ == "__main__":
    key = jax.random.PRNGKey(0)
    x = jax.random.normal(key, (2, 4, 16, 16), dtype=jnp.float32)  # NCHW

    model = ModelBase()
    assert model.num_parameters == (0, 0)

    y = jax.block_until_ready(model(x))

    # Forward of the (abstract) base is identity: verify exact pass-through.
    assert y.shape == x.shape and y.dtype == x.dtype
    assert bool(jnp.all(y == x))

    print("KERNEL_OK")
</pallas_src>

<mosaic_0001>
module attributes {stable_mosaic.version = 11 : i64} {
  func.func @kernel(%arg0: memref<2x4x16x16xf32, #tpu.memory_space<any>>, %arg1: memref<2x4x16x16xf32, #tpu.memory_space<any>>, %arg2: memref<1x!tpu.dma_semaphore, #tpu.memory_space<semaphore_mem>>) attributes {dimension_semantics = [], scalar_prefetch = 0 : i64, scratch_operands = 1 : i64, tpu.core_type = #tpu.core_type<tc>} {
    %c0_i32 = arith.constant 0 : i32
    %c0_i32_0 = arith.constant 0 : i32
    %c0_i32_1 = arith.constant 0 : i32
    %c0_i32_2 = arith.constant 0 : i32
    %c0_i32_3 = arith.constant 0 : i32
    %0 = tpu.memref_slice %arg0[%c0_i32_0, %c0_i32_1, %c0_i32_2, %c0_i32_3] : memref<2x4x16x16xf32, #tpu.memory_space<any>> -> memref<2x4x16x16xf32, #tpu.memory_space<any>>
    %c0_i32_4 = arith.constant 0 : i32
    %c0_i32_5 = arith.constant 0 : i32
    %c0_i32_6 = arith.constant 0 : i32
    %c0_i32_7 = arith.constant 0 : i32
    %1 = tpu.memref_slice %arg1[%c0_i32_4, %c0_i32_5, %c0_i32_6, %c0_i32_7] : memref<2x4x16x16xf32, #tpu.memory_space<any>> -> memref<2x4x16x16xf32, #tpu.memory_space<any>>
    %2 = tpu.memref_slice %arg2[%c0_i32] : memref<1x!tpu.dma_semaphore, #tpu.memory_space<semaphore_mem>> -> memref<1x!tpu.dma_semaphore, #tpu.memory_space<semaphore_mem>>
    %3 = tpu.memref_squeeze %2 : memref<1x!tpu.dma_semaphore, #tpu.memory_space<semaphore_mem>> -> memref<!tpu.dma_semaphore, #tpu.memory_space<semaphore_mem>>
    tpu.enqueue_dma source(%0 : memref<2x4x16x16xf32, #tpu.memory_space<any>>) target(%1 : memref<2x4x16x16xf32, #tpu.memory_space<any>>) target_semaphore(%3 : memref<!tpu.dma_semaphore, #tpu.memory_space<semaphore_mem>>)
    %c0_i32_8 = arith.constant 0 : i32
    %c0_i32_9 = arith.constant 0 : i32
    %c0_i32_10 = arith.constant 0 : i32
    %c0_i32_11 = arith.constant 0 : i32
    %c0_i32_12 = arith.constant 0 : i32
    %4 = tpu.memref_slice %arg0[%c0_i32_9, %c0_i32_10, %c0_i32_11, %c0_i32_12] : memref<2x4x16x16xf32, #tpu.memory_space<any>> -> memref<2x4x16x16xf32, #tpu.memory_space<any>>
    %c0_i32_13 = arith.constant 0 : i32
    %c0_i32_14 = arith.constant 0 : i32
    %c0_i32_15 = arith.constant 0 : i32
    %c0_i32_16 = arith.constant 0 : i32
    %5 = tpu.memref_slice %arg1[%c0_i32_13, %c0_i32_14, %c0_i32_15, %c0_i32_16] : memref<2x4x16x16xf32, #tpu.memory_space<any>> -> memref<2x4x16x16xf32, #tpu.memory_space<any>>
    %6 = tpu.memref_slice %arg2[%c0_i32_8] : memref<1x!tpu.dma_semaphore, #tpu.memory_space<semaphore_mem>> -> memref<1x!tpu.dma_semaphore, #tpu.memory_space<semaphore_mem>>
    %7 = tpu.memref_squeeze %6 : memref<1x!tpu.dma_semaphore, #tpu.memory_space<semaphore_mem>> -> memref<!tpu.dma_semaphore, #tpu.memory_space<semaphore_mem>>
    tpu.wait_dma2 semaphore(%7 : memref<!tpu.dma_semaphore, #tpu.memory_space<semaphore_mem>>) src(%4 : memref<2x4x16x16xf32, #tpu.memory_space<any>>) dst(%5 : memref<2x4x16x16xf32, #tpu.memory_space<any>>)
    return
  }
}

</mosaic_0001>

<bundles_post_ra>
// kernel: tpu_custom_call.1
= control target key start
LH: loop header
LB: loop body
LE: loop exit
PB: predicated region body
PF: predicated region fallthrough
CT: control target
= control target key end

     0   :  { %s30_s6 = smov [#allocation2]   ;;  %s31_s7 = smov 131072   ;;  %s49_s0 = inlined_call_operand.hbm [shape: f32[2,4,16,16], index: 0, kind: input, shape index: {}]   ;;  %s50_s1 = inlined_call_operand.hbm [shape: f32[2,4,16,16], index: 1, kind: output, shape index: {}]  }
   0x1   :  { %s32_s8 = smov 0  }
   0x2   :  { %12 = dma.general %s49_s0, 2048, %s50_s1, %s30_s6, %s31_s7, [#allocation4], %s32_s8, 0  }
   0x3   :  { %28 = dma.done.wait [#allocation2], 2048 }
   0x4   :  { %29 = vsyncadd [#allocation2], 4294965248 }
   0x5   :  { %18 = vsyncmov [#allocation2] }
   0x8   :  { %s19_s13 = vpop.sfrf %18 }
   0x9   :  { %p24_p0 = scmp.ne.s32.totalorder %s19_s13, 0 }
   0xb   :  { %23 = shalt.err (%p24_p0)  }

</bundles_post_ra>
